<compile_context>
chip_gen: v6e
topology: v6e:2x2x1
jax: 0.10.0
libtpu: 0.0.40
codegen_flags: <defaults>
</compile_context>

<pallas_src>
import functools

import jax
import jax.numpy as jnp
from jax import lax
from jax.experimental import pallas as pl
from jax.experimental.pallas import tpu as pltpu

LANE = 128


def _cam_fused_kernel(gamma_ref, x_ref, o_ref, acc_ref, attn_ref, *,
                      mm_dtype, approx_recip):
    """Fused CAM forward.

    grid = (B, phase, N_tiles); phase 0 accumulates energy, phase 1 applies
    attention. acc_ref (f32) and attn_ref (mm_dtype) are VMEM scratch that
    persist across the inner grid axes, so the attention never leaves VMEM.
    """
    p = pl.program_id(1)
    n = pl.program_id(2)
    last_n = pl.num_programs(2) - 1

    # ---------------- phase 0: energy accumulation over N tiles --------------
    @pl.when(jnp.logical_and(p == 0, n == 0))
    def _():
        acc_ref[...] = jnp.zeros_like(acc_ref)

    @pl.when(p == 0)
    def _():
        x = x_ref[0].astype(mm_dtype)                      # (C, tn)
        # x @ x^T by contracting both operands over the lane dim: no transpose.
        acc_ref[...] += lax.dot_general(
            x, x, dimension_numbers=(((1,), (1,)), ((), ())),
            preferred_element_type=jnp.float32)

    # -------- phase 0 finalize: attn = softmax(rowmax(E) - E) == softmax(-E) --
    @pl.when(jnp.logical_and(p == 0, n == last_n))
    def _():
        energy = acc_ref[...]
        row_min = jnp.min(energy, axis=-1, keepdims=True)  # single row reduction
        e = jnp.exp(row_min - energy)                      # all exponents <= 0
        denom = jnp.sum(e, axis=-1, keepdims=True)
        if approx_recip:
            attn = e * pl.reciprocal(denom, approx=True)   # EUP slot, ~free
        else:
            attn = e / denom
        attn_ref[...] = attn.astype(attn_ref.dtype)

    # ---------------- phase 1: out tile = attn @ x tile; residual ------------
    @pl.when(p == 1)
    def _():
        x = x_ref[0]                                       # (C, tn), input dtype
        out = jnp.dot(attn_ref[...], x.astype(mm_dtype),
                      preferred_element_type=jnp.float32)
        # Residual always in f32 so gamma == 0 reproduces x exactly.
        o_ref[0] = (gamma_ref[0] * out + x.astype(jnp.float32)).astype(o_ref.dtype)


def cam_forward(x, gamma, *, matmul_dtype=jnp.bfloat16, n_block_max=2048,
                vmem_budget_bytes=32 * 2**20, approx_softmax_recip=True):
    """CAM forward. x: (B, C, H, W), gamma: (1,) -> (B, C, H, W) in x.dtype.

    matmul_dtype:        dtype the MXU operands are cast to (f32 accumulation
                         always). Use jnp.float32 for parity with PyTorch.
    n_block_max:         upper bound on the lane (spatial) tile width.
    vmem_budget_bytes:   target VMEM footprint used to pick the N tile width.
    approx_softmax_recip: use the EUP approximate reciprocal for the softmax
                         denominator (fast; ~1e-3 relative row-sum error).
    """
    B, C, H, W = x.shape
    N = H * W

    x_flat = x.reshape(B, C, N)                            # native dtype, no upcast
    gamma = jnp.asarray(gamma, jnp.float32).reshape((1,))

    x_bytes = jnp.dtype(x_flat.dtype).itemsize
    mm_bytes = jnp.dtype(matmul_dtype).itemsize

    # ---- lane-dense N tiling: tn is a 128-aligned, VMEM-budget-aware width ---
    n128 = pl.cdiv(N, LANE) * LANE
    fixed_vmem = C * C * (4 + mm_bytes)                    # acc (f32) + attn (mm)
    per_lane_bytes = 4 * C * x_bytes                       # x + o, double-buffered
    avail = max(vmem_budget_bytes - fixed_vmem, per_lane_bytes * LANE)
    tn_cap = (avail // per_lane_bytes) // LANE * LANE
    tn_cap = max(LANE, min(tn_cap, max(LANE, (n_block_max // LANE) * LANE), n128))
    nb = pl.cdiv(n128, tn_cap)
    tn = pl.cdiv(n128 // LANE, nb) * LANE                  # pads < nb*128 lanes total
    n_padded = nb * tn
    if n_padded != N:
        # Zero columns contribute nothing to energy; padded output is sliced off.
        x_flat = jnp.pad(x_flat, ((0, 0), (0, 0), (0, n_padded - N)))

    est_vmem = fixed_vmem + per_lane_bytes * tn
    cp_kwargs = dict(dimension_semantics=("parallel", "arbitrary", "arbitrary"))
    if est_vmem > 12 * 2**20:
        # Raise the scoped VMEM limit only when the estimate needs it.
        cp_kwargs["vmem_limit_bytes"] = int(
            min(max(est_vmem * 3 // 2, 32 * 2**20), 100 * 2**20))

    out_flat = pl.pallas_call(
        functools.partial(_cam_fused_kernel, mm_dtype=matmul_dtype,
                          approx_recip=approx_softmax_recip),
        out_shape=jax.ShapeDtypeStruct((B, C, n_padded), x_flat.dtype),
        grid=(B, 2, nb),
        in_specs=[
            pl.BlockSpec(memory_space=pltpu.MemorySpace.SMEM),          # gamma
            pl.BlockSpec((1, C, tn), lambda b, p, n: (b, 0, n)),        # x tile
        ],
        # phase 0 parks the output on block (b,0,0); phase 1 writes tile n.
        out_specs=pl.BlockSpec((1, C, tn), lambda b, p, n: (b, 0, p * n)),
        scratch_shapes=[
            pltpu.VMEM((C, C), jnp.float32),     # energy accumulator
            pltpu.VMEM((C, C), matmul_dtype),    # softmaxed attention (mm dtype)
        ],
        compiler_params=pltpu.CompilerParams(**cp_kwargs),
    )(gamma, x_flat)

    if n_padded != N:
        out_flat = out_flat[:, :, :N]
    return out_flat.reshape(B, C, H, W)


def cam_reference(x, gamma):
    """Pure-JAX reference mirroring the PyTorch forward (f32 math)."""
    B, C, H, W = x.shape
    q = x.reshape(B, C, -1).astype(jnp.float32)                     # (B, C, N)
    energy = jnp.einsum('bcn,bdn->bcd', q, q,
                        precision=jax.lax.Precision.HIGHEST)        # (B, C, C)
    energy_new = jnp.max(energy, axis=-1, keepdims=True) - energy
    attn = jax.nn.softmax(energy_new, axis=-1)
    out = jnp.einsum('bcd,bdn->bcn', attn, q,
                     precision=jax.lax.Precision.HIGHEST).reshape(B, C, H, W)
    return (gamma[0] * out + x.astype(jnp.float32)).astype(x.dtype)


if __name__ == "__main__":
    key = jax.random.PRNGKey(0)
    k0, k1, k2 = jax.random.split(key, 3)

    # Small x magnitude (~1/sqrt(N)) keeps the channel softmax genuinely soft
    # so the attention matmul path is actually exercised numerically.
    B, C, H, W = 2, 4, 16, 16
    x = 0.06 * jax.random.normal(k0, (B, C, H, W), dtype=jnp.float32)
    gamma0 = jnp.zeros((1,), dtype=jnp.float32)
    gamma_half = jnp.full((1,), 0.5, dtype=jnp.float32)

    # 1) f32 matmul + exact reciprocal: parity with the PyTorch-equivalent ref.
    out_f32 = cam_forward(x, gamma_half, matmul_dtype=jnp.float32,
                          approx_softmax_recip=False)
    jax.block_until_ready(out_f32)
    ref = cam_reference(x, gamma_half)
    assert jnp.allclose(out_f32, ref, atol=1e-4, rtol=1e-4), "f32 parity mismatch"

    # 2) default bf16 fast path: gamma=0 must reproduce x exactly (f32 residual);
    #    gamma=0.5 stays within bf16 tolerance of the reference.
    out_bf0 = cam_forward(x, gamma0)
    jax.block_until_ready(out_bf0)
    assert jnp.allclose(out_bf0, x, atol=1e-6), "bf16 gamma=0 residual mismatch"
    out_bf1 = cam_forward(x, gamma_half)
    jax.block_until_ready(out_bf1)
    assert bool(jnp.all(jnp.isfinite(out_bf1))), "bf16 path produced non-finite values"
    assert jnp.allclose(out_bf1, ref, atol=2e-2, rtol=2e-2), "bf16 path drifted too far"

    # 3) lane padding: H=W=10 -> N=100 pads to 128 (zero cols don't change energy).
    x2 = 0.06 * jax.random.normal(k1, (1, 16, 10, 10), dtype=jnp.float32)
    out2 = cam_forward(x2, gamma_half, matmul_dtype=jnp.float32,
                       approx_softmax_recip=False)
    jax.block_until_ready(out2)
    assert jnp.allclose(out2, cam_reference(x2, gamma_half),
                        atol=1e-4, rtol=1e-4), "padded-N path mismatch"

    # 4) multi-tile streaming: force tn=128 so nb=2 exercises the fused
    #    two-phase grid (energy reduction over tiles, then apply over tiles).
    x3 = 0.06 * jax.random.normal(k2, (1, 8, 16, 16), dtype=jnp.float32)
    out3 = cam_forward(x3, gamma_half, matmul_dtype=jnp.float32,
                       n_block_max=128, approx_softmax_recip=False)
    jax.block_until_ready(out3)
    assert jnp.allclose(out3, cam_reference(x3, gamma_half),
                        atol=1e-4, rtol=1e-4), "multi-tile path mismatch"

    print("KERNEL_OK")
</pallas_src>

<mosaic_0001>
module attributes {stable_mosaic.version = 11 : i64} {
  func.func @_cam_fused_kernel(%arg0: i32, %arg1: i32, %arg2: i32, %arg3: memref<1xf32, #tpu.memory_space<smem>>, %arg4: memref<1x4x256xf32, #tpu.memory_space<vmem>>, %arg5: memref<1x4x256xf32, #tpu.memory_space<vmem>>, %arg6: memref<4x4xf32, #tpu.memory_space<vmem>>, %arg7: memref<4x4xf32, #tpu.memory_space<vmem>>) attributes {dimension_semantics = [#tpu.dimension_semantics<parallel>, #tpu.dimension_semantics<arbitrary>, #tpu.dimension_semantics<arbitrary>], iteration_bounds = array<i64: 2, 2, 1>, scalar_prefetch = 0 : i64, scratch_operands = 2 : i64, tpu.core_type = #tpu.core_type<tc>, window_params = [{transform_indices = @transform_0, window_bounds = array<i64: 1>}, {transform_indices = @transform_1, window_bounds = array<i64: 1, 4, 256>}, {transform_indices = @transform_2, window_bounds = array<i64: 1, 4, 256>}]} {
    %c0_i32 = arith.constant 0 : i32
    %0 = arith.cmpi eq, %arg1, %c0_i32 : i32
    %c0_i32_0 = arith.constant 0 : i32
    %1 = arith.cmpi eq, %arg2, %c0_i32_0 : i32
    %2 = arith.andi %0, %1 : i1
    %3 = arith.extui %2 : i1 to i32
    %c0_i32_1 = arith.constant 0 : i32
    %4 = arith.cmpi ne, %3, %c0_i32_1 : i32
    scf.if %4 {
      %cst = arith.constant 0.000000e+00 : f32
      %16 = vector.broadcast %cst : f32 to vector<4x4xf32>
      %c0 = arith.constant 0 : index
      %c0_8 = arith.constant 0 : index
      %17 = vector.load %arg6[%c0, %c0_8] : memref<4x4xf32, #tpu.memory_space<vmem>>, vector<4x4xf32>
      tpu.vector_store %arg6[%c0, %c0_8], %16 {strides = array<i32>} : memref<4x4xf32, #tpu.memory_space<vmem>>, vector<4x4xf32>,
    } else {
    }
    %c0_i32_2 = arith.constant 0 : i32
    %5 = arith.cmpi eq, %arg1, %c0_i32_2 : i32
    %6 = arith.extui %5 : i1 to i32
    %c0_i32_3 = arith.constant 0 : i32
    %7 = arith.cmpi ne, %6, %c0_i32_3 : i32
    scf.if %7 {
      %c0 = arith.constant 0 : index
      %c0_8 = arith.constant 0 : index
      %c0_9 = arith.constant 0 : index
      %16 = vector.load %arg4[%c0, %c0_8, %c0_9] : memref<1x4x256xf32, #tpu.memory_space<vmem>>, vector<1x4x256xf32>
      %17 = vector.shape_cast %16 : vector<1x4x256xf32> to vector<4x256xf32>
      %c0_10 = arith.constant 0 : index
      %c0_11 = arith.constant 0 : index
      %18 = vector.load %arg6[%c0_10, %c0_11] : memref<4x4xf32, #tpu.memory_space<vmem>>, vector<4x4xf32>
      %cst = arith.constant dense<0.000000e+00> : vector<4x4xf32>
      %19 = tpu.matmul %17, %17, %cst {dimension_numbers = #tpu.dot_dimension_numbers<[1], [1], [0], [0], [0, 0, 1, 0], [], []>} : vector<4x256xf32>, vector<4x256xf32>, vector<4x4xf32> -> vector<4x4xf32>
      %20 = arith.addf %18, %19 : vector<4x4xf32>
      %c0_12 = arith.constant 0 : index
      %c0_13 = arith.constant 0 : index
      %21 = vector.load %arg6[%c0_12, %c0_13] : memref<4x4xf32, #tpu.memory_space<vmem>>, vector<4x4xf32>
      tpu.vector_store %arg6[%c0_12, %c0_13], %20 {strides = array<i32>} : memref<4x4xf32, #tpu.memory_space<vmem>>, vector<4x4xf32>,
    } else {
    }
    %c0_i32_4 = arith.constant 0 : i32
    %8 = arith.cmpi eq, %arg1, %c0_i32_4 : i32
    %c0_i32_5 = arith.constant 0 : i32
    %9 = arith.cmpi eq, %arg2, %c0_i32_5 : i32
    %10 = arith.andi %8, %9 : i1
    %11 = arith.extui %10 : i1 to i32
    %c0_i32_6 = arith.constant 0 : i32
    %12 = arith.cmpi ne, %11, %c0_i32_6 : i32
    scf.if %12 {
      %c0 = arith.constant 0 : index
      %c0_8 = arith.constant 0 : index
      %16 = vector.load %arg6[%c0, %c0_8] : memref<4x4xf32, #tpu.memory_space<vmem>>, vector<4x4xf32>
      %cst = arith.constant dense<0x7F800000> : vector<4xf32>
      %17 = vector.multi_reduction <minimumf>, %16, %cst [1] : vector<4x4xf32> to vector<4xf32>
      %18 = vector.shape_cast %17 : vector<4xf32> to vector<4x1xf32>
      %19 = vector.broadcast %18 : vector<4x1xf32> to vector<4x4xf32>
      %20 = arith.subf %19, %16 : vector<4x4xf32>
      %21 = math.exp %20 : vector<4x4xf32>
      %cst_9 = arith.constant dense<0.000000e+00> : vector<4xf32>
      %22 = vector.multi_reduction <add>, %21, %cst_9 [1] : vector<4x4xf32> to vector<4xf32>
      %23 = vector.shape_cast %22 : vector<4xf32> to vector<4x1xf32>
      %24 = vector.broadcast %23 : vector<4x1xf32> to vector<4x4xf32>
      %25 = arith.divf %21, %24 : vector<4x4xf32>
      %c0_10 = arith.constant 0 : index
      %c0_11 = arith.constant 0 : index
      %26 = vector.load %arg7[%c0_10, %c0_11] : memref<4x4xf32, #tpu.memory_space<vmem>>, vector<4x4xf32>
      tpu.vector_store %arg7[%c0_10, %c0_11], %25 {strides = array<i32>} : memref<4x4xf32, #tpu.memory_space<vmem>>, vector<4x4xf32>,
    } else {
    }
    %c1_i32 = arith.constant 1 : i32
    %13 = arith.cmpi eq, %arg1, %c1_i32 : i32
    %14 = arith.extui %13 : i1 to i32
    %c0_i32_7 = arith.constant 0 : i32
    %15 = arith.cmpi ne, %14, %c0_i32_7 : i32
    scf.if %15 {
      %c0 = arith.constant 0 : index
      %c0_8 = arith.constant 0 : index
      %c0_9 = arith.constant 0 : index
      %16 = vector.load %arg4[%c0, %c0_8, %c0_9] : memref<1x4x256xf32, #tpu.memory_space<vmem>>, vector<1x4x256xf32>
      %17 = vector.shape_cast %16 : vector<1x4x256xf32> to vector<4x256xf32>
      %c0_10 = arith.constant 0 : index
      %c0_11 = arith.constant 0 : index
      %18 = vector.load %arg7[%c0_10, %c0_11] : memref<4x4xf32, #tpu.memory_space<vmem>>, vector<4x4xf32>
      %cst = arith.constant dense<0.000000e+00> : vector<4x256xf32>
      %19 = tpu.matmul %18, %17, %cst {dimension_numbers = #tpu.dot_dimension_numbers<[1], [0], [0], [1], [0, 0, 1, 1], [], []>} : vector<4x4xf32>, vector<4x256xf32>, vector<4x256xf32> -> vector<4x256xf32>
      %c0_12 = arith.constant 0 : index
      %20 = memref.load %arg3[%c0_12] : memref<1xf32, #tpu.memory_space<smem>>
      %21 = vector.broadcast %20 : f32 to vector<4x256xf32>
      %22 = arith.mulf %21, %19 : vector<4x256xf32>
      %23 = arith.addf %22, %17 : vector<4x256xf32>
      %c0_13 = arith.constant 0 : index
      %c0_14 = arith.constant 0 : index
      %c0_15 = arith.constant 0 : index
      %24 = vector.load %arg5[%c0_13, %c0_14, %c0_15] : memref<1x4x256xf32, #tpu.memory_space<vmem>>, vector<1x4x256xf32>
      %25 = vector.shape_cast %24 : vector<1x4x256xf32> to vector<4x256xf32>
      %26 = vector.shape_cast %23 : vector<4x256xf32> to vector<1x4x256xf32>
      tpu.vector_store %arg5[%c0_13, %c0_14, %c0_15], %26 {strides = array<i32>} : memref<1x4x256xf32, #tpu.memory_space<vmem>>, vector<1x4x256xf32>,
    } else {
    }
    return
  }
  func.func @transform_0(%arg0: i32, %arg1: i32, %arg2: i32) -> i32 {
    %c0_i32 = arith.constant 0 : i32
    %c0_i32_0 = arith.constant 0 : i32
    return %c0_i32 : i32
  }
  func.func @transform_1(%arg0: i32, %arg1: i32, %arg2: i32) -> (i32, i32, i32) {
    %c0_i32 = arith.constant 0 : i32
    %c0_i32_0 = arith.constant 0 : i32
    return %arg0, %c0_i32, %arg2 : i32, i32, i32
  }
  func.func @transform_2(%arg0: i32, %arg1: i32, %arg2: i32) -> (i32, i32, i32) {
    %0 = arith.muli %arg1, %arg2 : i32
    %c0_i32 = arith.constant 0 : i32
    %c0_i32_0 = arith.constant 0 : i32
    return %arg0, %c0_i32, %0 : i32, i32, i32
  }
}

</mosaic_0001>

<bundles_post_ra>
// kernel: tpu_custom_call.1
= control target key start
LH: loop header
LB: loop body
LE: loop exit
PB: predicated region body
PF: predicated region fallthrough
CT: control target
= control target key end

     0   :  { %s929_s0 = inlined_call_operand.<no memory space> [shape: f32[1], index: 0, kind: input, shape index: {}]   ;;  %s930_s1 = inlined_call_operand.hbm [shape: f32[2,4,256], index: 1, kind: input, shape index: {}]   ;;  %s931_s2 = inlined_call_operand.hbm [shape: f32[2,4,256], index: 2, kind: output, shape index: {}]  }
   0x1   :  { %7 = sst [smem:[#allocation4]] %s929_s0 }
   0x2   :  { %8 = vsyncpa [#allocation6], 0 }
   0x3   :  { %10 = vsyncpa [#allocation6 + $0x1], 0 }
   0x4   :  { %11 = vsyncpa [#allocation7], 0 }
   0x5   :  { %13 = vsyncpa [#allocation7 + $0x1], 0  ;;  %s762_s11 = smov 0   ;;  %s764_s12 = smov 0  }
   0x6   :  { %s766_s13 = smov 0   ;;  %s768_s14 = smov 0  }
   0x7   :  { %s770_s15 = smov 0   ;;  %s772_s16 = smov 0  }
   0x8   :  { %s774_s17 = smov 0   ;;  %s776_s18 = smov 0  }
   0x9 LB: > { %s504_s0 = sadd.s32 4294967295, %s738_s18   ;;  %s505_s19 = sadd.s32 4294967294, %s738_s18   ;;  %s738_s18 = sphi %s776_s18, %s19_s18   ;;  %s734_s17 = sphi %s774_s17, %s944_s17   ;;  %s730_s16 = sphi %s772_s16, %s943_s16   ;;  %s726_s15 = sphi %s770_s15, %s942_s15   ;;  %s722_s14 = sphi %s768_s14, %s941_s14   ;;  %s718_s13 = sphi %s766_s13, %s940_s13   ;;  %s714_s12 = sphi %s764_s12, %s939_s12   ;;  %s710_s11 = sphi %s762_s11, %s938_s11  }
   0xa   : > { %s34_s20 = sadd.s32 1, %s730_s16  ;;  %s38_s21 = sadd.s32 1, %s734_s17 }
   0xb   : > { %p36_p0 = scmp.ge.s32.totalorder %s34_s20, 2  ;;  %s68_s22 = sadd.s32 1, %s718_s13 }
   0xc   : > { %p75_p1 = scmp.ne.s32.totalorder %s718_s13, %s714_s12  ;;  %p76_p2 = scmp.eq.s32.totalorder %s738_s18, 0 }
   0xd   : > { %s946_s20 = smov (%p36_p0, %s34_s20), 0  ;;  %s948_s21 = smov (!%p36_p0, %s38_s21), %s734_s17 }
   0xe   : > { %p813_p3 = por %p76_p2, %p75_p1  ;;  %p81_p4 = scmp.ne.s32.totalorder %s714_s12, %s710_s11 }
   0xf   : > { %p40_p5 = scmp.ge.s32.totalorder %s948_s21, 2  ;;  %p82_p6 = scmp.eq.s32.totalorder %s504_s0, 0 }
  0x10   : > { %p109_p7 = scmp.eq.s32.totalorder %s504_s0, 3  ;;  %p115_p8 = scmp.eq.s32.totalorder %s505_s19, 3 }
  0x11   : > { %s950_s21 = smov (%p40_p5, %s948_s21), 0  ;;  %p821_p9 = por %p82_p6, %p81_p4 }
  0x12   : > { %p825_p10 = por %p109_p7, %p75_p1  ;;  %s63_s26 = ssub.s32 %s734_s17, %s950_s21 }
  0x13   : > { %p831_p11 = por %p115_p8, %p81_p4  ;;  %p66_p12 = scmp.eq.s32.totalorder %s63_s26, 0 }
  0x14   : > { %p540_p13 = scmp.lt.s32.totalorder %s738_s18, 4  ;;  %s138_s28 = sand.u32 1, %s718_s13  }
  0x15   : > { %s935_s27 = scalar_select %p831_p11, 1, 0 }
  0x16   : > { %s838_s29 = scalar_select %p66_p12, %s718_s13, %s68_s22  }
  0x17   : > { %s508_s30 = sshll.u32 %s138_s28, 3  ;;  %s525_s3 = sshll.u32 %s734_s17, 7 }
  0x18   : > { %s150_s6 = scalar_lea.hbm %s930_s1, %s525_s3  ;;  %s142_s7 = scalar_lea.vmem [#allocation5], %s508_s30 }
  0x19   : > { %s152_s8 = sshll.u32 %s142_s7, 4  ;;  %p846_p0 = pnand %p540_p13, %p813_p3  ;;  %s153_s8 = int_to_ptr.vmem [resolvable:$true] %s152_s8 }
  0x1a   : > { %p511_p1 = scmp.ge.s32.totalorder %s738_s18, 1  ;;  %p157_p2 = scmp.lt.s32.totalorder %s738_s18, 5 }
  0x1b   : > { %s139_s10 = scalar_lea.sflag [#allocation6], %s138_s28  ;;  %p616_p4 = pneg %p846_p0 }
  0x1c   : > { %s627_s0 = scalar_lea.vmem %s153_s8, 128  ;;  %s740_s19 = smov [#allocation5]  }
  0x1d   : > { %p628_p5 = scmp.ne.s32.totalorder %s153_s8, %s627_s0  ;;  %s632_s22 = sshll.u32 %s740_s19, 4  ;;  %s633_s22 = int_to_ptr.vmem [resolvable:$false] %s632_s22 }
  0x1e   : > { %s634_s26 = scalar_lea.vmem %s633_s22, 256  ;;  %p635_p8 = scmp.lt.s32.totalorder %s153_s8, %s633_s22 }
  0x1f   : > { %p630_p6 = pnand %p628_p5, %p616_p4  ;;  %p636_p12 = scmp.lt.s32.totalorder %s634_s26, %s627_s0 }
  0x21   : > { %p631_p7 = pneg %p630_p6  ;;  %p637_p3 = por %p636_p12, %p635_p8 }
  0x23   : > { %p638_p13 = pnand %p637_p3, %p631_p7 }
  0x25   : > { %641 = shalt.err (!%p638_p13)
}
  0x26   : > { %535 = dma.hbm_to_vmem [thread:$0]  (!%p846_p0), %s150_s6, 128, %s153_s8, %s139_s10  }
  0x27   : > { %p158_p11 = pnand %p511_p1, %p157_p2 }
  0x28   : > { %s861_s23 = sand.u32 (!%p158_p11), 1, %s714_s12  }
  0x29   : > { %161 = sbr.rel (%p158_p11) target bundleno = 821 (0x335), region = 28  ;;  %s512_s28 = sshll.u32 (!%p158_p11), %s861_s23, 3 }
  0x2a   : > { %s164_s30 = scalar_lea.sflag (!%p158_p11), [#allocation6], %s861_s23  ;;  %s865_s3 = scalar_lea.vmem (!%p158_p11), [#allocation5], %s512_s28 }
  0x2e   : > { %701 = dma.done.wait (%p821_p9), %s164_s30, 128  }
  0x2f   : > { %703 = vsyncadd (%p821_p9), %s164_s30, 4294967168  ;;  %p191_p0 = scmp.eq.s32.totalorder %s722_s14, 0  ;;  %s872_s4 = scalar_lea.vmem [#allocation8], %s512_s28 }
  0x30   : > { %vm197_vm0 = vcmask (%p191_p0), 27648   ;;  %v741_v0 = vmov (%p191_p0), 0.0  }
  0x31   : > { %196 = sbr.rel (!%p191_p0) target bundleno = 54 (0x36), region = 36  ;;  %198 = vst.msk [vmem:[#allocation2] sm:$0xf] (%p191_p0), %vm197_vm0, %v741_v0 }
  0x36 PF: > { %p515_p11 = scmp.ne.s32.totalorder %s722_s14, 0 }
  0x38   : > { %201 = sbr.rel (%p515_p11) target bundleno = 264 (0x108), region = 40 }
  0x3d   : > { %v202_v1 = vld [vmem:[%s865_s3] sm:$0xff]  ;;  %v203_v3 = vld [vmem:[#allocation2] sm:$0xf]  ;;  %vm278_vm1 = vcmask 27648  }
  0x3e   : > { %v205_v2 = vcombine.high %v202_v1, %v202_v1 }
  0x40   : > { %237 = vmatprep.subr.mxu0 %v205_v2  ;;  %271 = vmatprep.mubr.f32.mxu0 %v205_v2 }
  0x41   : > { %238 = vmatpush1.xpose.msra.mxu0 %v202_v1 }
  0x44   : > { %272 = vmatmul.mubr.f32.vlgmr.msra.gmra.mxu0 %v202_v1 }
 0x104   : > { %v273_v4 = vpop.f32.mrf.mxu0 }
 0x105   : > { %v277_v5 = vadd.f32 %v273_v4, %v203_v3 }
 0x106   : > { %v275_v6 = vpop.f32.mrf.mxu0 }
 0x107   : > { %279 = vst.msk [vmem:[#allocation2] sm:$0xf] %vm278_vm1, %v277_v5 }
 0x108 PF: > { %281 = sbr.rel (!%p191_p0) target bundleno = 584 (0x248), region = 44  ;;  %vm283_vm2 = vcmask (%p191_p0), 27648  }
 0x10e   : > { %v282_v7 = vld [vmem:[#allocation2] sm:$0xf] }
 0x10f   : > { %v284_v8 = vsel %vm283_vm2, %v282_v7, inf }
 0x110   : > { %285 = vmin.xlane.f32.xlu0 %v284_v8 }
 0x199   : > { %v286_v9 = vpop.xlane.xlu0 %285 }
 0x19a   : > { %v287_v10 = vsub.f32 %v286_v9, %v282_v7 }
 0x19c   : > { %v288_v11 = vmul.f32 1.442695, %v287_v10 }
 0x19e   : > { %609 = vpow2.f32 %v288_v11 }
 0x1ab   : > { %v610_v12 = vpop.eup %609 }
 0x1ac   : > { %v290_v13 = vsel %vm283_vm2, %v610_v12, 0.0 }
 0x1ad   : > { %291 = vadd.xlane.f32.xlu0 %v290_v13 }
 0x236   : > { %v292_v14 = vpop.xlane.xlu0 %291 }
 0x237   : > { %611 = vrcp.f32 %v292_v14 }
 0x244   : > { %v612_v15 = vpop.eup %611 }
 0x245   : > { %v294_v16 = vmul.f32 %v612_v15, %v610_v12 }
 0x247   : > { %295 = vst.msk [vmem:[#allocation3] sm:$0xf] %vm283_vm2, %v294_v16 }
 0x248 PF: > { %p516_p9 = scmp.ne.s32.totalorder %s722_s14, 1 }
 0x249   : > { %s384_s24 = sld [smem:[#allocation4]] (!%p516_p9) }
 0x24a   : > { %299 = sbr.rel (%p516_p9) target bundleno = 798 (0x31e), region = 48 }
 0x24f   : > { %v300_v17 = vld [vmem:[%s865_s3] sm:$0xff]  ;;  %vm308_vm3 = vcmask 1043456   ;;  %v742_v19 = vmov 0.0   ;;  %v301_v20 = vld [vmem:[#allocation3] sm:$0xf]  ;;  %vm304_vm4 = vcmask 31744   ;;  %v385_v21 = vstv %s384_s24 }
 0x250   : > { %v303_v18 = vcombine.high %v300_v17, %v300_v17  ;;  %377 = vmatprep.mubr.f32.mxu0 %v742_v19 }
 0x252   : > { %517 = vmatprep.subr.msk.mxu0 %vm308_vm3, %v303_v18 }
 0x253   : > { %518 = vmatpush1.msk.msra.mxu0 %vm308_vm3, %v300_v17 }
 0x254   : > { %519 = vmatmul.mubr.msk.f32.vlgmr.msra.gmra.mxu0 %vm304_vm4, %v301_v20 }
 0x314   : > { %v379_v22 = vpop.f32.mrf.mxu0 }
 0x315   : > { %v386_v23 = vmul.f32 %v385_v21, %v379_v22 }
 0x316   : > { %v381_v24 = vpop.f32.mrf.mxu0 }
 0x317   : > { %v387_v25 = vmul.f32 %v385_v21, %v381_v24  ;;  %v389_v26 = vadd.f32 %v386_v23, %v300_v17 }
 0x319   : > { %v390_v27 = vadd.f32 %v387_v25, %v303_v18 }
 0x31b   : > { %v393_v28 = vcombine.low %v389_v26, %v390_v27 }
 0x31d   : > { %395 = vst [vmem:[%s872_s4] sm:$0xff] %v393_v28 }
 0x31e PF: > { %s527_s14 = sshll.u32 %s726_s15, 7  ;;  %s414_s8 = sshll.u32 %s872_s4, 4  ;;  %s415_s8 = int_to_ptr.vmem [resolvable:$true] %s414_s8 }
 0x31f   : > { %s412_s7 = scalar_lea.hbm %s931_s2, %s527_s14  ;;  %s397_s9 = scalar_lea.sflag [#allocation7], %s861_s23 }
 0x320   : > { %s642_s10 = scalar_lea.vmem %s415_s8, 128  ;;  %s743_s0 = smov [#allocation8]  }
 0x321   : > { %p643_p1 = scmp.ne.s32.totalorder %s415_s8, %s642_s10  ;;  %s646_s19 = sshll.u32 %s743_s0, 4  ;;  %s647_s19 = int_to_ptr.vmem [resolvable:$false] %s646_s19 }
 0x322   : > { %s648_s22 = scalar_lea.vmem %s647_s19, 256  ;;  %p649_p5 = scmp.lt.s32.totalorder %s415_s8, %s647_s19 }
 0x323   : > { %p644_p2 = pnand %p643_p1, %p825_p10  ;;  %p650_p6 = scmp.lt.s32.totalorder %s648_s22, %s642_s10 }
 0x325   : > { %p645_p4 = pneg %p644_p2  ;;  %p651_p7 = por %p650_p6, %p649_p5 }
 0x327   : > { %p652_p8 = pnand %p651_p7, %p645_p4 }
 0x329   : > { %655 = shalt.err (!%p652_p8)
}
 0x32a   : > { %s656_s15 = scalar_lea.hbm %s412_s7, 128  ;;  %s660_s28 = scalar_lea.hbm %s931_s2, 256 }
 0x32b   : > { %p657_p12 = scmp.ne.s32.totalorder %s412_s7, %s656_s15  ;;  %p661_p0 = scmp.lt.s32.totalorder %s412_s7, %s931_s2 }
 0x32c   : > { %p662_p11 = scmp.lt.s32.totalorder %s660_s28, %s656_s15 }
 0x32d   : > { %p658_p3 = pnand %p657_p12, %p825_p10 }
 0x32e   : > { %p663_p9 = por %p662_p11, %p661_p0 }
 0x32f   : > { %p659_p13 = pneg %p658_p3 }
 0x331   : > { %p664_p1 = pnand %p663_p9, %p659_p13 }
 0x333   : > { %667 = shalt.err (!%p664_p1)
}
 0x334   : > { %530 = dma.vmem_to_hbm [thread:$0]  (%p825_p10), %s415_s8, 128, %s412_s7, %s397_s9  }
 0x335 PF: > { %p541_p2 = scmp.ge.s32.totalorder %s738_s18, 2  ;;  %s426_s4 = sand.u32 1, %s710_s11  }
 0x336   : > { %p937_p4 = scmp.ne.s32.totalorder %s935_s27, 0  ;;  %s427_s24 = scalar_lea.sflag [#allocation7], %s426_s4 }
 0x338   : > { %p537_p5 = pnand %p541_p2, %p937_p4 }
 0x33a   : > { %p538_p6 = pneg %p537_p5 }
 0x33c   : > { %705 = dma.done.wait (%p538_p6), %s427_s24, 128  }
 0x33d   : > { %707 = vsyncadd (%p538_p6), %s427_s24, 4294967168  ;;  %s19_s18 = sadd.s32 1, %s738_s18   ;;  %s938_s11 = smov %s714_s12 }
 0x33e   : > { %p16_p7 = scmp.ge.s32.totalorder %s19_s18, 6   ;;  %s939_s12 = smov %s718_s13 }
 0x33f   : > { %s940_s13 = smov %s838_s29  ;;  %s941_s14 = smov %s730_s16 }
 0x340   : > { %s942_s15 = smov %s734_s17  ;;  %s943_s16 = smov %s946_s20 }
 0x341   : > { %s944_s17 = smov %s950_s21  ;;  %18 = sbr.rel (!%p16_p7) target bundleno = 9 (0x9), region = 89 }
 0x346   :  { %432 = vsyncpa [#allocation6], 1 }
 0x347   :  { %434 = vsyncpa [#allocation6 + $0x1], 1 }
 0x348   :  { %435 = vsyncpa [#allocation7], 1 }
 0x349   :  { %437 = vsyncpa [#allocation7 + $0x1], 1 }

</bundles_post_ra>
